<compile_context>
chip_gen: v7x
topology: tpu7x:2x2x1
jax: 0.10.0
libtpu: 0.0.40
codegen_flags: <defaults>
</compile_context>

<pallas_src>
import functools

import jax
import jax.numpy as jnp
from jax.experimental import pallas as pl
from jax.experimental.pallas import tpu as pltpu

_LANE = 128
_BN_EPS = 1e-5
_VMEM_BUDGET = 28 * 2**20          # resident-weights design breaks first on v7x (64 MiB)
_V5E_DEFAULT_SCOPED = 12 * 2**20   # conservative margin under v5e's 16 MiB default


def _round_up(n, m=_LANE):
    return ((n + m - 1) // m) * m


def _fused_mlp_kernel(num_layers, *refs):
    """Whole MLP in one kernel.  refs = (x, W0, s0, W1, s1, ..., out).

    Each layer: h = f32(bf16(h) @ W_l_bf16) + shift_l ; ReLU on all but last.
    BN (eval) already folded into W/shift; dropout is identity in eval mode.
    """
    x_ref = refs[0]
    o_ref = refs[-1]
    h = x_ref[...]
    for li in range(num_layers):
        w_ref = refs[1 + 2 * li]
        s_ref = refs[2 + 2 * li]
        h = jnp.dot(h.astype(jnp.bfloat16), w_ref[...],
                    preferred_element_type=jnp.float32) + s_ref[...]
        if li < num_layers - 1:
            h = jnp.maximum(h, 0.0)
    o_ref[...] = h.astype(o_ref.dtype)


def _pick_batch_tile(B):
    """Full batch for tiny B; otherwise 128..512, preferring >=2 grid steps
    (v7x megacore) once the batch is large enough to amortize ~0.35us/step."""
    if B <= 128:
        return B
    for cand in (512, 256):
        if cand <= B // 2:
            return cand
    return 128


def _vmem_estimate(tb, D, fused_params, out_pad, weight_bufs=1):
    """Rough resident-VMEM bytes: double-buffered x/out blocks, resident
    weights/shifts, f32 intermediate per layer."""
    est = 2 * tb * D * 4 + 2 * tb * out_pad * 4
    for w, s in fused_params:
        est += weight_bufs * (w.size * w.dtype.itemsize + s.size * s.dtype.itemsize)
        est += tb * w.shape[1] * 4
    return est


def feed_forward_classifier(x, fused_params, output_dim):
    """Forward pass: one fused Pallas call over all layers, then slice padding."""
    B_orig, D = x.shape
    num_layers = len(fused_params)
    out_pad = fused_params[-1][0].shape[1]

    # --- batch tiling / padding (parallel axis -> shardable across v7x TCs) ---
    tb = _pick_batch_tile(B_orig)
    while tb > 128 and _vmem_estimate(tb, D, fused_params, out_pad) > _VMEM_BUDGET:
        tb //= 2
    # TODO(synk): if still over budget at tb=128, stream weights over a K/N grid axis.

    B = _round_up(B_orig, tb)
    if B != B_orig:
        x = jnp.pad(x, ((0, B - B_orig), (0, 0)))
    grid = (B // tb,)

    est = _vmem_estimate(tb, D, fused_params, out_pad)
    vmem_limit = int(min(56 * 2**20, 2 * est)) if est > _V5E_DEFAULT_SCOPED else None

    # --- cost estimate (padded dims = actual MXU/DMA work) ---
    flops = 0
    bytes_accessed = (x.size + B * out_pad) * 4
    inputs = [x]
    for w, s in fused_params:
        inputs.append(w)
        inputs.append(s)
        flops += 2 * B * w.shape[0] * w.shape[1]
        bytes_accessed += w.size * w.dtype.itemsize + s.size * s.dtype.itemsize

    # NOTE: input feature dim (32) is left unpadded: full-block spec is legal and
    # the sparse-lane x load only matters if x is re-streamed many times.
    def _run(single_buffer_weights):
        in_specs = [pl.BlockSpec((tb, D), lambda i: (i, 0))]
        for w, s in fused_params:
            if single_buffer_weights:
                # Constant across grid steps -> no need for the implicit 2x buffer.
                in_specs.append(pl.BlockSpec(w.shape, lambda i: (0, 0),
                                             pipeline_mode=pl.Buffered(buffer_count=1)))
                in_specs.append(pl.BlockSpec(s.shape, lambda i: (0, 0),
                                             pipeline_mode=pl.Buffered(buffer_count=1)))
            else:
                in_specs.append(pl.BlockSpec(w.shape, lambda i: (0, 0)))
                in_specs.append(pl.BlockSpec(s.shape, lambda i: (0, 0)))
        return pl.pallas_call(
            functools.partial(_fused_mlp_kernel, num_layers),
            out_shape=jax.ShapeDtypeStruct((B, out_pad), jnp.float32),
            grid=grid,
            in_specs=in_specs,
            out_specs=pl.BlockSpec((tb, out_pad), lambda i: (i, 0)),
            compiler_params=pltpu.CompilerParams(
                dimension_semantics=("parallel",),
                vmem_limit_bytes=vmem_limit),
            cost_estimate=pl.CostEstimate(
                flops=flops, transcendentals=0, bytes_accessed=bytes_accessed),
        )(*inputs)

    try:
        out = _run(single_buffer_weights=True)
    except Exception:
        # pipeline_mode=Buffered(1) unsupported on this JAX version; default buffering.
        out = _run(single_buffer_weights=False)

    return out[:B_orig, :output_dim]


def init_params(key, input_dim, output_dim, hidden_sizes):
    """Deterministic raw parameters mirroring the PyTorch module (eval mode)."""
    raw = []
    prev = input_dim
    dims = list(hidden_sizes) + [output_dim]
    for li, h in enumerate(dims):
        key, kw, kb, kg, kbeta, km, kv = jax.random.split(key, 7)
        bound = 1.0 / (prev ** 0.5)
        w = jax.random.uniform(kw, (prev, h), jnp.float32, -bound, bound)  # [in, out]
        b = jax.random.uniform(kb, (h,), jnp.float32, -bound, bound)
        is_hidden = li < len(hidden_sizes)
        if is_hidden:
            gamma = 1.0 + 0.1 * jax.random.normal(kg, (h,), jnp.float32)
            beta = 0.1 * jax.random.normal(kbeta, (h,), jnp.float32)
            mean = 0.05 * jax.random.normal(km, (h,), jnp.float32)
            var = 1.0 + 0.1 * jax.random.uniform(kv, (h,), jnp.float32)
        else:
            gamma = beta = mean = var = None
        raw.append(dict(w=w, b=b, gamma=gamma, beta=beta, mean=mean, var=var,
                        relu=is_hidden))
        prev = h
    return raw


def fold_and_pad(raw_params, input_dim):
    """Fold eval-mode BN into (W, shift), zero-pad feature dims to 128, and
    cast W to bf16 for the native MXU path (shift stays f32 for the f32 add).

    Padded output columns get W=0 / shift=0, so they stay exactly zero through
    ReLU; padded input rows of the next layer's W are also zero, so padding
    never leaks into the logical result.
    """
    fused = []
    prev_pad = input_dim  # input feature dim left unpadded (full-block spec is legal)
    for p in raw_params:
        d_in, d_out = p["w"].shape
        d_out_pad = _round_up(d_out)
        if p["gamma"] is not None:
            scale = p["gamma"] / jnp.sqrt(p["var"] + _BN_EPS)
            shift = p["beta"] - p["mean"] * scale
        else:
            scale = jnp.ones((d_out,), jnp.float32)
            shift = jnp.zeros((d_out,), jnp.float32)
        w_folded = p["w"] * scale[None, :]
        shift_folded = p["b"] * scale + shift
        w_pad = jnp.zeros((prev_pad, d_out_pad), jnp.float32)
        w_pad = w_pad.at[:d_in, :d_out].set(w_folded)
        s_pad = jnp.zeros((1, d_out_pad), jnp.float32)
        s_pad = s_pad.at[0, :d_out].set(shift_folded)
        fused.append((w_pad.astype(jnp.bfloat16), s_pad))
        prev_pad = d_out_pad
    return fused


def _reference(x, raw_params):
    """Pure-JAX eval-mode reference (unfolded, unpadded, f32)."""
    h = x
    for p in raw_params:
        y = h @ p["w"] + p["b"]
        if p["relu"]:
            y = (y - p["mean"]) / jnp.sqrt(p["var"] + _BN_EPS) * p["gamma"] + p["beta"]
            y = jnp.maximum(y, 0.0)
        h = y
    return h


if __name__ == "__main__":
    input_dim = 32
    output_dim = 8
    hidden_sizes = [256, 128, 64]
    batch = 16

    key = jax.random.PRNGKey(0)
    kx, kp = jax.random.split(key)
    x = jax.random.normal(kx, (batch, input_dim), jnp.float32)

    raw_params = init_params(kp, input_dim, output_dim, hidden_sizes)
    fused_params = fold_and_pad(raw_params, input_dim)

    out = feed_forward_classifier(x, fused_params, output_dim)
    out = jax.block_until_ready(out)

    ref = _reference(x, raw_params)
    assert out.shape == (batch, output_dim)
    # bf16 weights/activations on the dot -> looser tolerance than pure f32.
    assert jnp.allclose(out, ref, atol=3e-2, rtol=3e-2), "mismatch vs reference"
    print("KERNEL_OK")
</pallas_src>

<mosaic_0001>
module attributes {stable_mosaic.version = 11 : i64} {
  func.func @_fused_mlp_kernel(%arg0: i32, %arg1: memref<16x32xf32, #tpu.memory_space<vmem>>, %arg2: memref<32x256xbf16, #tpu.memory_space<vmem>>, %arg3: memref<1x256xf32, #tpu.memory_space<vmem>>, %arg4: memref<256x128xbf16, #tpu.memory_space<vmem>>, %arg5: memref<1x128xf32, #tpu.memory_space<vmem>>, %arg6: memref<128x128xbf16, #tpu.memory_space<vmem>>, %arg7: memref<1x128xf32, #tpu.memory_space<vmem>>, %arg8: memref<128x128xbf16, #tpu.memory_space<vmem>>, %arg9: memref<1x128xf32, #tpu.memory_space<vmem>>, %arg10: memref<16x128xf32, #tpu.memory_space<vmem>>) attributes {dimension_semantics = [#tpu.dimension_semantics<parallel>], iteration_bounds = array<i64: 1>, scalar_prefetch = 0 : i64, scratch_operands = 0 : i64, tpu.core_type = #tpu.core_type<tc>, window_params = [{transform_indices = @transform_0, window_bounds = array<i64: 16, 32>}, {pipeline_mode = #tpu.pipeline_mode<synchronous>, transform_indices = @transform_1, window_bounds = array<i64: 32, 256>}, {pipeline_mode = #tpu.pipeline_mode<synchronous>, transform_indices = @transform_2, window_bounds = array<i64: 1, 256>}, {pipeline_mode = #tpu.pipeline_mode<synchronous>, transform_indices = @transform_3, window_bounds = array<i64: 256, 128>}, {pipeline_mode = #tpu.pipeline_mode<synchronous>, transform_indices = @transform_4, window_bounds = array<i64: 1, 128>}, {pipeline_mode = #tpu.pipeline_mode<synchronous>, transform_indices = @transform_5, window_bounds = array<i64: 128, 128>}, {pipeline_mode = #tpu.pipeline_mode<synchronous>, transform_indices = @transform_6, window_bounds = array<i64: 1, 128>}, {pipeline_mode = #tpu.pipeline_mode<synchronous>, transform_indices = @transform_7, window_bounds = array<i64: 128, 128>}, {pipeline_mode = #tpu.pipeline_mode<synchronous>, transform_indices = @transform_8, window_bounds = array<i64: 1, 128>}, {transform_indices = @transform_9, window_bounds = array<i64: 16, 128>}]} {
    %c0 = arith.constant 0 : index
    %c0_0 = arith.constant 0 : index
    %0 = vector.load %arg1[%c0, %c0_0] : memref<16x32xf32, #tpu.memory_space<vmem>>, vector<16x32xf32>
    %1 = arith.truncf %0 : vector<16x32xf32> to vector<16x32xbf16>
    %c0_1 = arith.constant 0 : index
    %c0_2 = arith.constant 0 : index
    %2 = vector.load %arg2[%c0_1, %c0_2] : memref<32x256xbf16, #tpu.memory_space<vmem>>, vector<32x256xbf16>
    %cst = arith.constant dense<0.000000e+00> : vector<16x256xf32>
    %3 = tpu.matmul %1, %2, %cst {dimension_numbers = #tpu.dot_dimension_numbers<[1], [0], [0], [1], [0, 0, 1, 1], [], []>} : vector<16x32xbf16>, vector<32x256xbf16>, vector<16x256xf32> -> vector<16x256xf32>
    %c0_3 = arith.constant 0 : index
    %c0_4 = arith.constant 0 : index
    %4 = vector.load %arg3[%c0_3, %c0_4] : memref<1x256xf32, #tpu.memory_space<vmem>>, vector<1x256xf32>
    %5 = vector.broadcast %4 : vector<1x256xf32> to vector<16x256xf32>
    %6 = arith.addf %3, %5 : vector<16x256xf32>
    %cst_5 = arith.constant 0.000000e+00 : f32
    %7 = vector.broadcast %cst_5 : f32 to vector<16x256xf32>
    %8 = arith.maximumf %6, %7 : vector<16x256xf32>
    %9 = arith.truncf %8 : vector<16x256xf32> to vector<16x256xbf16>
    %c0_6 = arith.constant 0 : index
    %c0_7 = arith.constant 0 : index
    %10 = vector.load %arg4[%c0_6, %c0_7] : memref<256x128xbf16, #tpu.memory_space<vmem>>, vector<256x128xbf16>
    %cst_8 = arith.constant dense<0.000000e+00> : vector<16x128xf32>
    %11 = tpu.matmul %9, %10, %cst_8 {dimension_numbers = #tpu.dot_dimension_numbers<[1], [0], [0], [1], [0, 0, 1, 1], [], []>} : vector<16x256xbf16>, vector<256x128xbf16>, vector<16x128xf32> -> vector<16x128xf32>
    %c0_9 = arith.constant 0 : index
    %c0_10 = arith.constant 0 : index
    %12 = vector.load %arg5[%c0_9, %c0_10] : memref<1x128xf32, #tpu.memory_space<vmem>>, vector<1x128xf32>
    %13 = vector.broadcast %12 : vector<1x128xf32> to vector<16x128xf32>
    %14 = arith.addf %11, %13 : vector<16x128xf32>
    %cst_11 = arith.constant 0.000000e+00 : f32
    %15 = vector.broadcast %cst_11 : f32 to vector<16x128xf32>
    %16 = arith.maximumf %14, %15 : vector<16x128xf32>
    %17 = arith.truncf %16 : vector<16x128xf32> to vector<16x128xbf16>
    %c0_12 = arith.constant 0 : index
    %c0_13 = arith.constant 0 : index
    %18 = vector.load %arg6[%c0_12, %c0_13] : memref<128x128xbf16, #tpu.memory_space<vmem>>, vector<128x128xbf16>
    %cst_14 = arith.constant dense<0.000000e+00> : vector<16x128xf32>
    %19 = tpu.matmul %17, %18, %cst_14 {dimension_numbers = #tpu.dot_dimension_numbers<[1], [0], [0], [1], [0, 0, 1, 1], [], []>} : vector<16x128xbf16>, vector<128x128xbf16>, vector<16x128xf32> -> vector<16x128xf32>
    %c0_15 = arith.constant 0 : index
    %c0_16 = arith.constant 0 : index
    %20 = vector.load %arg7[%c0_15, %c0_16] : memref<1x128xf32, #tpu.memory_space<vmem>>, vector<1x128xf32>
    %21 = vector.broadcast %20 : vector<1x128xf32> to vector<16x128xf32>
    %22 = arith.addf %19, %21 : vector<16x128xf32>
    %cst_17 = arith.constant 0.000000e+00 : f32
    %23 = vector.broadcast %cst_17 : f32 to vector<16x128xf32>
    %24 = arith.maximumf %22, %23 : vector<16x128xf32>
    %25 = arith.truncf %24 : vector<16x128xf32> to vector<16x128xbf16>
    %c0_18 = arith.constant 0 : index
    %c0_19 = arith.constant 0 : index
    %26 = vector.load %arg8[%c0_18, %c0_19] : memref<128x128xbf16, #tpu.memory_space<vmem>>, vector<128x128xbf16>
    %cst_20 = arith.constant dense<0.000000e+00> : vector<16x128xf32>
    %27 = tpu.matmul %25, %26, %cst_20 {dimension_numbers = #tpu.dot_dimension_numbers<[1], [0], [0], [1], [0, 0, 1, 1], [], []>} : vector<16x128xbf16>, vector<128x128xbf16>, vector<16x128xf32> -> vector<16x128xf32>
    %c0_21 = arith.constant 0 : index
    %c0_22 = arith.constant 0 : index
    %28 = vector.load %arg9[%c0_21, %c0_22] : memref<1x128xf32, #tpu.memory_space<vmem>>, vector<1x128xf32>
    %29 = vector.broadcast %28 : vector<1x128xf32> to vector<16x128xf32>
    %30 = arith.addf %27, %29 : vector<16x128xf32>
    %c0_23 = arith.constant 0 : index
    %c0_24 = arith.constant 0 : index
    %31 = vector.load %arg10[%c0_23, %c0_24] : memref<16x128xf32, #tpu.memory_space<vmem>>, vector<16x128xf32>
    tpu.vector_store %arg10[%c0_23, %c0_24], %30 {strides = array<i32>} : memref<16x128xf32, #tpu.memory_space<vmem>>, vector<16x128xf32>,
    return
  }
  func.func @transform_0(%arg0: i32) -> (i32, i32) {
    %c0_i32 = arith.constant 0 : i32
    %c0_i32_0 = arith.constant 0 : i32
    return %arg0, %c0_i32 : i32, i32
  }
  func.func @transform_1(%arg0: i32) -> (i32, i32) {
    %c0_i32 = arith.constant 0 : i32
    %c0_i32_0 = arith.constant 0 : i32
    %c0_i32_1 = arith.constant 0 : i32
    return %c0_i32, %c0_i32_0 : i32, i32
  }
  func.func @transform_2(%arg0: i32) -> (i32, i32) {
    %c0_i32 = arith.constant 0 : i32
    %c0_i32_0 = arith.constant 0 : i32
    %c0_i32_1 = arith.constant 0 : i32
    return %c0_i32, %c0_i32_0 : i32, i32
  }
  func.func @transform_3(%arg0: i32) -> (i32, i32) {
    %c0_i32 = arith.constant 0 : i32
    %c0_i32_0 = arith.constant 0 : i32
    %c0_i32_1 = arith.constant 0 : i32
    return %c0_i32, %c0_i32_0 : i32, i32
  }
  func.func @transform_4(%arg0: i32) -> (i32, i32) {
    %c0_i32 = arith.constant 0 : i32
    %c0_i32_0 = arith.constant 0 : i32
    %c0_i32_1 = arith.constant 0 : i32
    return %c0_i32, %c0_i32_0 : i32, i32
  }
  func.func @transform_5(%arg0: i32) -> (i32, i32) {
    %c0_i32 = arith.constant 0 : i32
    %c0_i32_0 = arith.constant 0 : i32
    %c0_i32_1 = arith.constant 0 : i32
    return %c0_i32, %c0_i32_0 : i32, i32
  }
  func.func @transform_6(%arg0: i32) -> (i32, i32) {
    %c0_i32 = arith.constant 0 : i32
    %c0_i32_0 = arith.constant 0 : i32
    %c0_i32_1 = arith.constant 0 : i32
    return %c0_i32, %c0_i32_0 : i32, i32
  }
  func.func @transform_7(%arg0: i32) -> (i32, i32) {
    %c0_i32 = arith.constant 0 : i32
    %c0_i32_0 = arith.constant 0 : i32
    %c0_i32_1 = arith.constant 0 : i32
    return %c0_i32, %c0_i32_0 : i32, i32
  }
  func.func @transform_8(%arg0: i32) -> (i32, i32) {
    %c0_i32 = arith.constant 0 : i32
    %c0_i32_0 = arith.constant 0 : i32
    %c0_i32_1 = arith.constant 0 : i32
    return %c0_i32, %c0_i32_0 : i32, i32
  }
  func.func @transform_9(%arg0: i32) -> (i32, i32) {
    %c0_i32 = arith.constant 0 : i32
    %c0_i32_0 = arith.constant 0 : i32
    return %arg0, %c0_i32 : i32, i32
  }
}

module attributes {stable_mosaic.version = 11 : i64} {
  func.func @_fused_mlp_kernel(%arg0: i32, %arg1: memref<16x32xf32, #tpu.memory_space<vmem>>, %arg2: memref<32x256xbf16, #tpu.memory_space<vmem>>, %arg3: memref<1x256xf32, #tpu.memory_space<vmem>>, %arg4: memref<256x128xbf16, #tpu.memory_space<vmem>>, %arg5: memref<1x128xf32, #tpu.memory_space<vmem>>, %arg6: memref<128x128xbf16, #tpu.memory_space<vmem>>, %arg7: memref<1x128xf32, #tpu.memory_space<vmem>>, %arg8: memref<128x128xbf16, #tpu.memory_space<vmem>>, %arg9: memref<1x128xf32, #tpu.memory_space<vmem>>, %arg10: memref<16x128xf32, #tpu.memory_space<vmem>>) attributes {dimension_semantics = [#tpu.dimension_semantics<parallel>], iteration_bounds = array<i64: 1>, scalar_prefetch = 0 : i64, scratch_operands = 0 : i64, tpu.core_type = #tpu.core_type<tc>, window_params = [{transform_indices = @transform_0, window_bounds = array<i64: 16, 32>}, {pipeline_mode = #tpu.pipeline_mode<synchronous>, transform_indices = @transform_1, window_bounds = array<i64: 32, 256>}, {pipeline_mode = #tpu.pipeline_mode<synchronous>, transform_indices = @transform_2, window_bounds = array<i64: 1, 256>}, {pipeline_mode = #tpu.pipeline_mode<synchronous>, transform_indices = @transform_3, window_bounds = array<i64: 256, 128>}, {pipeline_mode = #tpu.pipeline_mode<synchronous>, transform_indices = @transform_4, window_bounds = array<i64: 1, 128>}, {pipeline_mode = #tpu.pipeline_mode<synchronous>, transform_indices = @transform_5, window_bounds = array<i64: 128, 128>}, {pipeline_mode = #tpu.pipeline_mode<synchronous>, transform_indices = @transform_6, window_bounds = array<i64: 1, 128>}, {pipeline_mode = #tpu.pipeline_mode<synchronous>, transform_indices = @transform_7, window_bounds = array<i64: 128, 128>}, {pipeline_mode = #tpu.pipeline_mode<synchronous>, transform_indices = @transform_8, window_bounds = array<i64: 1, 128>}, {transform_indices = @transform_9, window_bounds = array<i64: 16, 128>}]} {
    %c0 = arith.constant 0 : index
    %c0_0 = arith.constant 0 : index
    %0 = vector.load %arg1[%c0, %c0_0] : memref<16x32xf32, #tpu.memory_space<vmem>>, vector<16x32xf32>
    %1 = arith.truncf %0 : vector<16x32xf32> to vector<16x32xbf16>
    %c0_1 = arith.constant 0 : index
    %c0_2 = arith.constant 0 : index
    %2 = vector.load %arg2[%c0_1, %c0_2] : memref<32x256xbf16, #tpu.memory_space<vmem>>, vector<32x256xbf16>
    %cst = arith.constant dense<0.000000e+00> : vector<16x256xf32>
    %3 = tpu.matmul %1, %2, %cst {dimension_numbers = #tpu.dot_dimension_numbers<[1], [0], [0], [1], [0, 0, 1, 1], [], []>} : vector<16x32xbf16>, vector<32x256xbf16>, vector<16x256xf32> -> vector<16x256xf32>
    %c0_3 = arith.constant 0 : index
    %c0_4 = arith.constant 0 : index
    %4 = vector.load %arg3[%c0_3, %c0_4] : memref<1x256xf32, #tpu.memory_space<vmem>>, vector<1x256xf32>
    %5 = vector.broadcast %4 : vector<1x256xf32> to vector<16x256xf32>
    %6 = arith.addf %3, %5 : vector<16x256xf32>
    %cst_5 = arith.constant 0.000000e+00 : f32
    %7 = vector.broadcast %cst_5 : f32 to vector<16x256xf32>
    %8 = arith.maximumf %6, %7 : vector<16x256xf32>
    %9 = arith.truncf %8 : vector<16x256xf32> to vector<16x256xbf16>
    %c0_6 = arith.constant 0 : index
    %c0_7 = arith.constant 0 : index
    %10 = vector.load %arg4[%c0_6, %c0_7] : memref<256x128xbf16, #tpu.memory_space<vmem>>, vector<256x128xbf16>
    %cst_8 = arith.constant dense<0.000000e+00> : vector<16x128xf32>
    %11 = tpu.matmul %9, %10, %cst_8 {dimension_numbers = #tpu.dot_dimension_numbers<[1], [0], [0], [1], [0, 0, 1, 1], [], []>} : vector<16x256xbf16>, vector<256x128xbf16>, vector<16x128xf32> -> vector<16x128xf32>
    %c0_9 = arith.constant 0 : index
    %c0_10 = arith.constant 0 : index
    %12 = vector.load %arg5[%c0_9, %c0_10] : memref<1x128xf32, #tpu.memory_space<vmem>>, vector<1x128xf32>
    %13 = vector.broadcast %12 : vector<1x128xf32> to vector<16x128xf32>
    %14 = arith.addf %11, %13 : vector<16x128xf32>
    %cst_11 = arith.constant 0.000000e+00 : f32
    %15 = vector.broadcast %cst_11 : f32 to vector<16x128xf32>
    %16 = arith.maximumf %14, %15 : vector<16x128xf32>
    %17 = arith.truncf %16 : vector<16x128xf32> to vector<16x128xbf16>
    %c0_12 = arith.constant 0 : index
    %c0_13 = arith.constant 0 : index
    %18 = vector.load %arg6[%c0_12, %c0_13] : memref<128x128xbf16, #tpu.memory_space<vmem>>, vector<128x128xbf16>
    %cst_14 = arith.constant dense<0.000000e+00> : vector<16x128xf32>
    %19 = tpu.matmul %17, %18, %cst_14 {dimension_numbers = #tpu.dot_dimension_numbers<[1], [0], [0], [1], [0, 0, 1, 1], [], []>} : vector<16x128xbf16>, vector<128x128xbf16>, vector<16x128xf32> -> vector<16x128xf32>
    %c0_15 = arith.constant 0 : index
    %c0_16 = arith.constant 0 : index
    %20 = vector.load %arg7[%c0_15, %c0_16] : memref<1x128xf32, #tpu.memory_space<vmem>>, vector<1x128xf32>
    %21 = vector.broadcast %20 : vector<1x128xf32> to vector<16x128xf32>
    %22 = arith.addf %19, %21 : vector<16x128xf32>
    %cst_17 = arith.constant 0.000000e+00 : f32
    %23 = vector.broadcast %cst_17 : f32 to vector<16x128xf32>
    %24 = arith.maximumf %22, %23 : vector<16x128xf32>
    %25 = arith.truncf %24 : vector<16x128xf32> to vector<16x128xbf16>
    %c0_18 = arith.constant 0 : index
    %c0_19 = arith.constant 0 : index
    %26 = vector.load %arg8[%c0_18, %c0_19] : memref<128x128xbf16, #tpu.memory_space<vmem>>, vector<128x128xbf16>
    %cst_20 = arith.constant dense<0.000000e+00> : vector<16x128xf32>
    %27 = tpu.matmul %25, %26, %cst_20 {dimension_numbers = #tpu.dot_dimension_numbers<[1], [0], [0], [1], [0, 0, 1, 1], [], []>} : vector<16x128xbf16>, vector<128x128xbf16>, vector<16x128xf32> -> vector<16x128xf32>
    %c0_21 = arith.constant 0 : index
    %c0_22 = arith.constant 0 : index
    %28 = vector.load %arg9[%c0_21, %c0_22] : memref<1x128xf32, #tpu.memory_space<vmem>>, vector<1x128xf32>
    %29 = vector.broadcast %28 : vector<1x128xf32> to vector<16x128xf32>
    %30 = arith.addf %27, %29 : vector<16x128xf32>
    %c0_23 = arith.constant 0 : index
    %c0_24 = arith.constant 0 : index
    %31 = vector.load %arg10[%c0_23, %c0_24] : memref<16x128xf32, #tpu.memory_space<vmem>>, vector<16x128xf32>
    tpu.vector_store %arg10[%c0_23, %c0_24], %30 {strides = array<i32>} : memref<16x128xf32, #tpu.memory_space<vmem>>, vector<16x128xf32>,
    return
  }
  func.func @transform_0(%arg0: i32) -> (i32, i32) {
    %c0_i32 = arith.constant 0 : i32
    %c0_i32_0 = arith.constant 0 : i32
    return %arg0, %c0_i32 : i32, i32
  }
  func.func @transform_1(%arg0: i32) -> (i32, i32) {
    %c0_i32 = arith.constant 0 : i32
    %c0_i32_0 = arith.constant 0 : i32
    %c0_i32_1 = arith.constant 0 : i32
    return %c0_i32, %c0_i32_0 : i32, i32
  }
  func.func @transform_2(%arg0: i32) -> (i32, i32) {
    %c0_i32 = arith.constant 0 : i32
    %c0_i32_0 = arith.constant 0 : i32
    %c0_i32_1 = arith.constant 0 : i32
    return %c0_i32, %c0_i32_0 : i32, i32
  }
  func.func @transform_3(%arg0: i32) -> (i32, i32) {
    %c0_i32 = arith.constant 0 : i32
    %c0_i32_0 = arith.constant 0 : i32
    %c0_i32_1 = arith.constant 0 : i32
    return %c0_i32, %c0_i32_0 : i32, i32
  }
  func.func @transform_4(%arg0: i32) -> (i32, i32) {
    %c0_i32 = arith.constant 0 : i32
    %c0_i32_0 = arith.constant 0 : i32
    %c0_i32_1 = arith.constant 0 : i32
    return %c0_i32, %c0_i32_0 : i32, i32
  }
  func.func @transform_5(%arg0: i32) -> (i32, i32) {
    %c0_i32 = arith.constant 0 : i32
    %c0_i32_0 = arith.constant 0 : i32
    %c0_i32_1 = arith.constant 0 : i32
    return %c0_i32, %c0_i32_0 : i32, i32
  }
  func.func @transform_6(%arg0: i32) -> (i32, i32) {
    %c0_i32 = arith.constant 0 : i32
    %c0_i32_0 = arith.constant 0 : i32
    %c0_i32_1 = arith.constant 0 : i32
    return %c0_i32, %c0_i32_0 : i32, i32
  }
  func.func @transform_7(%arg0: i32) -> (i32, i32) {
    %c0_i32 = arith.constant 0 : i32
    %c0_i32_0 = arith.constant 0 : i32
    %c0_i32_1 = arith.constant 0 : i32
    return %c0_i32, %c0_i32_0 : i32, i32
  }
  func.func @transform_8(%arg0: i32) -> (i32, i32) {
    %c0_i32 = arith.constant 0 : i32
    %c0_i32_0 = arith.constant 0 : i32
    %c0_i32_1 = arith.constant 0 : i32
    return %c0_i32, %c0_i32_0 : i32, i32
  }
  func.func @transform_9(%arg0: i32) -> (i32, i32) {
    %c0_i32 = arith.constant 0 : i32
    %c0_i32_0 = arith.constant 0 : i32
    return %arg0, %c0_i32 : i32, i32
  }
}

</mosaic_0001>

<bundles_post_ra>
// kernel: tpu_custom_call.1
= control target key start
LH: loop header
LB: loop body
LE: loop exit
PB: predicated region body
PF: predicated region fallthrough
CT: control target
= control target key end

     0   :  { %14 = vsyncpa [#allocation3], 0  ;;  %s1115_s0 = inlined_call_operand.hbm [shape: f32[16,32], index: 0, kind: input, shape index: {}]   ;;  %s1116_s1 = inlined_call_operand.hbm [shape: bf16[32,256], index: 1, kind: input, shape index: {}]   ;;  %s1117_s2 = inlined_call_operand.vmem [shape: f32[1,256], index: 2, kind: input, shape index: {}]   ;;  %s1118_s3 = inlined_call_operand.hbm [shape: bf16[256,128], index: 3, kind: input, shape index: {}]   ;;  %s1119_s4 = inlined_call_operand.vmem [shape: f32[1,128], index: 4, kind: input, shape index: {}]   ;;  %s1120_s5 = inlined_call_operand.hbm [shape: bf16[128,128], index: 5, kind: input, shape index: {}]   ;;  %s1121_s6 = inlined_call_operand.vmem [shape: f32[1,128], index: 6, kind: input, shape index: {}]   ;;  %s1122_s7 = inlined_call_operand.hbm [shape: bf16[128,128], index: 7, kind: input, shape index: {}]   ;;  %s1123_s8 = inlined_call_operand.vmem [shape: f32[1,128], index: 8, kind: input, shape index: {}]   ;;  %s1124_s9 = inlined_call_operand.hbm [shape: f32[16,128], index: 9, kind: output, shape index: {}]  }
   0x1   :  { %15 = vsyncpa [#allocation6], 0 }
   0x2   :  { %16 = vsyncpa [#allocation9], 0 }
   0x3   :  { %17 = vsyncpa [#allocation4], 0  ;;  %s932_s30 = smov [#allocation5]   ;;  %s792_s13 = scalar_lea.hbm %s1116_s1, 512 }
   0x4   :  { %s35_s10 = sshll.u32 %s932_s30, 4  ;;  %p793_p0 = scmp.ne.s32.totalorder %s1116_s1, %s792_s13  ;;  %s36_s10 = int_to_ptr.vmem [resolvable:$true] %s35_s10 }
   0x5   :  { %p796_p1 = scmp.lt.u32.totalorder %s792_s13, %s1116_s1 }
   0x7   :  { %p798_p2 = pnand %p796_p1, %p793_p0 }
   0x9   :  { %801 = shalt.err (!%p798_p2)
}
   0xa   :  { %s802_s18 = scalar_lea.vmem %s36_s10, 512  ;;  %p807_p4 = scmp.lt.s32.totalorder %s36_s10, %s36_s10 }
   0xb   :  { %p803_p3 = scmp.ne.s32.totalorder %s36_s10, %s802_s18  ;;  %p808_p5 = scmp.lt.s32.totalorder %s802_s18, %s802_s18 }
   0xd   :  { %p809_p6 = por %p808_p5, %p807_p4 }
   0xf   :  { %p810_p7 = pnand %p809_p6, %p803_p3 }
  0x11   :  { %813 = shalt.err (!%p810_p7)
}
  0x12   :  { %s933_s19 = smov 128   ;;  %s934_s20 = smov 8  }
  0x13   :  { %41 = dma.hbm_to_vmem [thread:$0]  %s1116_s1, 512, %s36_s10, [#allocation6], %s933_s19, %s933_s19, %s934_s20  }
  0x14   :  { %s935_s23 = smov [#allocation8]   ;;  %s936_s25 = smov [#allocation2]  }
  0x15   :  { %s63_s24 = sshll.u32 %s935_s23, 4  ;;  %s23_s26 = sshll.u32 %s936_s25, 4  ;;  %s64_s24 = int_to_ptr.vmem [resolvable:$true] %s63_s24  ;;  %s24_s26 = int_to_ptr.vmem [resolvable:$true] %s23_s26 }
  0x16   :  { %s814_s29 = scalar_lea.hbm %s1120_s5, 1024 }
  0x17   :  { %p815_p8 = scmp.ne.s32.totalorder %s1120_s5, %s814_s29  ;;  %p818_p9 = scmp.lt.u32.totalorder %s814_s29, %s1120_s5 }
  0x19   :  { %p820_p10 = pnand %p818_p9, %p815_p8 }
  0x1b   :  { %823 = shalt.err (!%p820_p10)
}
  0x1c   :  { %s824_s1 = scalar_lea.vmem %s64_s24, 1024  ;;  %p829_p12 = scmp.lt.s32.totalorder %s64_s24, %s64_s24 }
  0x1d   :  { %p825_p11 = scmp.ne.s32.totalorder %s64_s24, %s824_s1  ;;  %p830_p13 = scmp.lt.s32.totalorder %s824_s1, %s824_s1 }
  0x1f   :  { %p831_p0 = por %p830_p13, %p829_p12 }
  0x21   :  { %p832_p1 = pnand %p831_p0, %p825_p11 }
  0x23   :  { %835 = shalt.err (!%p832_p1)
}
  0x24   :  { %s937_s10 = smov 64   ;;  %s938_s14 = smov 4  }
  0x25   :  { %69 = dma.hbm_to_vmem [thread:$0]  %s1120_s5, 1024, %s64_s24, [#allocation9], %s937_s10, %s937_s10, %s938_s14  }
  0x26   :  { %s836_s21 = scalar_lea.hbm %s1115_s0, 256 }
  0x27   :  { %p837_p2 = scmp.ne.s32.totalorder %s1115_s0, %s836_s21  ;;  %p840_p3 = scmp.lt.u32.totalorder %s836_s21, %s1115_s0 }
  0x29   :  { %p842_p4 = pnand %p840_p3, %p837_p2 }
  0x2b   :  { %845 = shalt.err (!%p842_p4)
}
  0x2c   :  { %s846_s28 = scalar_lea.vmem %s24_s26, 256  ;;  %p851_p6 = scmp.lt.s32.totalorder %s24_s26, %s24_s26 }
  0x2d   :  { %p847_p5 = scmp.ne.s32.totalorder %s24_s26, %s846_s28  ;;  %p852_p7 = scmp.lt.s32.totalorder %s846_s28, %s846_s28 }
  0x2f   :  { %p853_p8 = por %p852_p7, %p851_p6 }
  0x31   :  { %p854_p9 = pnand %p853_p8, %p847_p5 }
  0x33   :  { %857 = shalt.err (!%p854_p9)
}
  0x34   :  { %29 = dma.hbm_to_vmem [thread:$0]  %s1115_s0, 256, %s24_s26, [#allocation3], %s933_s19, %s933_s19, %s934_s20  }
  0x35   :  { %s939_s29 = smov [#allocation7]   ;;  %s940_s11 = smov [#allocation10]  }
  0x36   :  { %s49_s30 = sshll.u32 %s939_s29, 4  ;;  %s77_s12 = sshll.u32 %s940_s11, 4  ;;  %s50_s30 = int_to_ptr.vmem [resolvable:$true] %s49_s30  ;;  %s78_s12 = int_to_ptr.vmem [resolvable:$true] %s77_s12 }
  0x37   :  { %s858_s15 = scalar_lea.hbm %s1118_s3, 2048 }
  0x38   :  { %p859_p10 = scmp.ne.s32.totalorder %s1118_s3, %s858_s15  ;;  %p862_p11 = scmp.lt.u32.totalorder %s858_s15, %s1118_s3 }
  0x3a   :  { %p864_p12 = pnand %p862_p11, %p859_p10 }
  0x3c   :  { %867 = shalt.err (!%p864_p12)
}
  0x3d   :  { %s868_s0 = scalar_lea.vmem %s50_s30, 2048  ;;  %p873_p0 = scmp.lt.s32.totalorder %s50_s30, %s50_s30 }
  0x3e   :  { %p869_p13 = scmp.ne.s32.totalorder %s50_s30, %s868_s0  ;;  %p874_p1 = scmp.lt.s32.totalorder %s868_s0, %s868_s0 }
  0x40   :  { %p875_p2 = por %p874_p1, %p873_p0 }
  0x42   :  { %p876_p3 = pnand %p875_p2, %p869_p13 }
  0x44   :  { %879 = shalt.err (!%p876_p3)
}
  0x45   :  { %55 = dma.hbm_to_vmem [thread:$0]  %s1118_s3, 2048, %s50_s30, [#allocation6], %s937_s10, %s937_s10, %s938_s14  }
  0x46   :  { %s880_s27 = scalar_lea.hbm %s1122_s7, 1024 }
  0x47   :  { %p881_p4 = scmp.ne.s32.totalorder %s1122_s7, %s880_s27  ;;  %p884_p5 = scmp.lt.u32.totalorder %s880_s27, %s1122_s7 }
  0x49   :  { %p886_p6 = pnand %p884_p5, %p881_p4 }
  0x4b   :  { %889 = shalt.err (!%p886_p6)
}
  0x4c   :  { %s890_s11 = scalar_lea.vmem %s78_s12, 1024  ;;  %p895_p8 = scmp.lt.s32.totalorder %s78_s12, %s78_s12 }
  0x4d   :  { %p891_p7 = scmp.ne.s32.totalorder %s78_s12, %s890_s11  ;;  %p896_p9 = scmp.lt.s32.totalorder %s890_s11, %s890_s11 }
  0x4f   :  { %p897_p10 = por %p896_p9, %p895_p8 }
  0x51   :  { %p898_p11 = pnand %p897_p10, %p891_p7 }
  0x53   :  { %901 = shalt.err (!%p898_p11)
}
  0x54   :  { %83 = dma.hbm_to_vmem [thread:$0]  %s1122_s7, 1024, %s78_s12, [#allocation9], %s937_s10, %s937_s10, %s938_s14  }
  0x55   :  { %924 = dma.done.wait [#allocation3], 256  }
  0x56   :  { %925 = vsyncadd [#allocation3], 4294967040 }
  0x57   :  { %926 = dma.done.wait [#allocation6], 2560  }
  0x58   :  { %927 = vsyncadd [#allocation6], 4294964736 }
  0x59   :  { %928 = dma.done.wait [#allocation9], 2048  }
  0x5a   :  { %929 = vsyncadd [#allocation9], 4294965248  ;;  %v941_v0 = vmov 0   ;;  %v754_v1 = vld [vmem:[#allocation5 + $0x4] ss:$8 sps:$4 sm:$0xff]   ;;  %v102_v5 = vld [vmem:[#allocation2] sm:$0xff]  ;;  %v111_v30 = vlaneseq }
  0x5b   :  { %177 = vmatprep.mubr.bf16.mxu0 %v941_v0  ;;  %v756_v2 = vld [vmem:[#allocation5] ss:$8 sps:$4 sm:$0xff]   ;;  %145 = vmatprep.subr.bf16.mxu0 %v754_v1  ;;  %v757_v3 = vld [vmem:[#allocation5 + $0x14] ss:$8 sps:$4 sm:$0xff]   ;;  %v759_v4 = vld [vmem:[#allocation5 + $0x10] ss:$8 sps:$4 sm:$0xff]  }
  0x5c   :  { %146 = vmatpush1.bf16.msra.mxu0 %v756_v2  ;;  %v103_v6 = vld [vmem:[#allocation2 + $0x8] sm:$0xff]  ;;  %v760_v7 = vld [vmem:[#allocation7 + $0x40] sm:$0xff]   ;;  %v762_v10 = vld [vmem:[#allocation7 + $0x48] sm:$0xff]   ;;  %vm141_vm0 = vcmask 261120   ;;  %v942_v25 = vmov 0.0   ;;  %v112_v31 = vshrl.u32 %v111_v30, 7 }
  0x5d   :  { %147 = vmatprep.subr.bf16.mxu0 %v757_v3  ;;  %v761_v8 = vld [vmem:[#allocation7] sm:$0xff]   ;;  %v104_v9 = vpack.c.bf16 %v103_v6, %v102_v5  ;;  %661 = vmatprep.subr.bf16.mxu1 %v760_v7  ;;  %v763_v11 = vld [vmem:[#allocation7 + $0x8] sm:$0xff]   ;;  %v764_v12 = vld [vmem:[#allocation7 + $0x50] sm:$0xff]   ;;  %vm943_vm1 = vmmov 0   ;;  %s944_s15 = smov [#allocation11]  }
  0x5e   :  { %662 = vmatpush3.bf16.msra.mxu1 %v761_v8  ;;  %v765_v13 = vld [vmem:[#allocation7 + $0x10] sm:$0xff]   ;;  %v766_v14 = vld [vmem:[#allocation7 + $0x58] sm:$0xff]   ;;  %v768_v16 = vld [vmem:[#allocation7 + $0x60] sm:$0xff]   ;;  %v113_v32 = vsub.s32 0, %v112_v31  ;;  %v117_v34 = vsub.s32 1, %v112_v31  ;;  %s607_s16 = sshll.u32 %s944_s15, 4  ;;  %s608_s16 = int_to_ptr.vmem [resolvable:$true] %s607_s16 }
  0x5f   :  { %663 = vmatprep.subr.bf16.mxu1 %v762_v10  ;;  %v767_v15 = vld [vmem:[#allocation7 + $0x18] sm:$0xff]   ;;  %v769_v17 = vld [vmem:[#allocation7 + $0x20] sm:$0xff]   ;;  %v770_v18 = vld [vmem:[#allocation7 + $0x68] sm:$0xff]   ;;  %p907_p13 = scmp.lt.s32.totalorder %s608_s16, %s608_s16 }
  0x60   :  { %148 = vmatpush1.bf16.msra.mxu0 %v759_v4  ;;  %v771_v19 = vld [vmem:[#allocation7 + $0x28] sm:$0xff]   ;;  %v772_v20 = vld [vmem:[#allocation7 + $0x70] sm:$0xff]   ;;  %v774_v22 = vld [vmem:[#allocation7 + $0x78] sm:$0xff]  }
  0x61   :  { %v773_v21 = vld [vmem:[#allocation7 + $0x30] sm:$0xff]   ;;  %v775_v23 = vld [vmem:[#allocation7 + $0x38] sm:$0xff]   ;;  %v776_v24 = vld [vmem:[#allocation8] sm:$0xff]   ;;  %701 = vmatprep.subr.bf16.mxu0 %v942_v25 }
  0x62   :  { %664 = vmatpush3.bf16.msra.mxu1 %v763_v11  ;;  %v777_v26 = vld [vmem:[#allocation8 + $0x8] sm:$0xff]   ;;  %v778_v27 = vld [vmem:[#allocation8 + $0x10] sm:$0xff]   ;;  %v779_v28 = vld [vmem:[#allocation8 + $0x18] sm:$0xff]  }
  0x63   :  { %625 = vmatmul.mubr.msk.bf16.vlgmr.msra.gmra.mrb[0].mxu0 %vm141_vm0, %v104_v9  ;;  %665 = vmatprep.subr.bf16.mxu1 %v764_v12  ;;  %v780_v29 = vld [vmem:[#allocation8 + $0x20] sm:$0xff]   ;;  %v109_v33 = vld [vmem:[%s1117_s2] sm:$0x3]  ;;  %v781_v51 = vld [vmem:[#allocation8 + $0x28] sm:$0xff]  }
  0x64   :  { %702 = vmatpush3.bf16.msra.mxu0 %v776_v24  ;;  %v114_v35 = vrot.slane %v109_v33, %v113_v32  ;;  %v118_v36 = vrot.slane %v109_v33, %v117_v34  ;;  %v782_v52 = vld [vmem:[#allocation8 + $0x30] sm:$0xff]   ;;  %v783_v53 = vld [vmem:[#allocation8 + $0x38] sm:$0xff]   ;;  %717 = vmatprep.mubr.msk.bf16.mxu0 %vm943_vm1, %v942_v25  ;;  %v784_v54 = vld [vmem:[#allocation10] sm:$0xff]  }
  0x65   :  { %703 = vmatprep.subr.bf16.mxu0 %v942_v25  ;;  %v785_v55 = vld [vmem:[#allocation10 + $0x8] sm:$0xff]   ;;  %v786_v56 = vld [vmem:[#allocation10 + $0x10] sm:$0xff]   ;;  %v787_v57 = vld [vmem:[#allocation10 + $0x18] sm:$0xff]  }
  0x66   :  { %666 = vmatpush3.bf16.msra.mxu1 %v765_v13  ;;  %v788_v58 = vld [vmem:[#allocation10 + $0x20] sm:$0xff]   ;;  %v789_v59 = vld [vmem:[#allocation10 + $0x28] sm:$0xff]   ;;  %v626_v61 = vld [vmem:[%s1119_s4] ss:$0 sm:$0xff] }
  0x67   :  { %667 = vmatprep.subr.bf16.mxu1 %v766_v14  ;;  %v790_v8 = vld [vmem:[#allocation10 + $0x30] sm:$0xff]   ;;  %v791_v9 = vld [vmem:[#allocation10 + $0x38] sm:$0xff]  }
  0x68   :  { %704 = vmatpush3.bf16.msra.mxu0 %v777_v26  ;;  %v643_v10 = vld [vmem:[%s1121_s6] ss:$0 sm:$0xff]  ;;  %s902_s6 = scalar_lea.vmem %s608_s16, 256 }
  0x69   :  { %705 = vmatprep.subr.bf16.mxu0 %v942_v25  ;;  %p903_p12 = scmp.ne.s32.totalorder %s608_s16, %s902_s6  ;;  %p908_p0 = scmp.lt.s32.totalorder %s902_s6, %s902_s6 }
  0x6a   :  { %668 = vmatpush3.bf16.msra.mxu1 %v767_v15 }
  0x6b   :  { %669 = vmatprep.subr.bf16.mxu1 %v768_v16  ;;  %p909_p1 = por %p908_p0, %p907_p13 }
  0x6c   :  { %706 = vmatpush3.bf16.msra.mxu0 %v778_v27 }
  0x6d   :  { %707 = vmatprep.subr.bf16.mxu0 %v942_v25  ;;  %p910_p2 = pnand %p909_p1, %p903_p12 }
  0x6e   :  { %670 = vmatpush3.bf16.msra.mxu1 %v769_v17 }
  0x6f   :  { %671 = vmatprep.subr.bf16.mxu1 %v770_v18 }
  0x70   :  { %708 = vmatpush3.bf16.msra.mxu0 %v779_v28 }
  0x71   :  { %709 = vmatprep.subr.bf16.mxu0 %v942_v25 }
  0x72   :  { %672 = vmatpush3.bf16.msra.mxu1 %v771_v19 }
  0x73   :  { %673 = vmatprep.subr.bf16.mxu1 %v772_v20  ;;  %v652_v20 = vld [vmem:[%s1123_s8] ss:$0 sm:$0xff] }
  0x74   :  { %710 = vmatpush3.bf16.msra.mxu0 %v780_v29 }
  0x75   :  { %711 = vmatprep.subr.bf16.mxu0 %v942_v25 }
  0x76   :  { %674 = vmatpush3.bf16.msra.mxu1 %v773_v21 }
  0x77   :  { %675 = vmatprep.subr.bf16.mxu1 %v774_v22 }
  0x78   :  { %712 = vmatpush3.bf16.msra.mxu0 %v781_v51 }
  0x79   :  { %713 = vmatprep.subr.bf16.mxu0 %v942_v25 }
  0x7a   :  { %676 = vmatpush3.bf16.msra.mxu1 %v775_v23 }
  0x7b   :  { %721 = vmatprep.subr.bf16.mxu1 %v942_v25 }
  0x7c   :  { %714 = vmatpush3.bf16.msra.mxu0 %v782_v52 }
  0x7d   :  { %715 = vmatprep.subr.bf16.mxu0 %v942_v25 }
  0x80   :  { %716 = vmatpush3.bf16.msra.mxu0 %v783_v53 }
 0x136   :  { %v179_v37 = vpop.f32.mrb[0].mxu0 }
 0x137   :  { %v180_v38 = vadd.f32 %v179_v37, %v114_v35  ;;  %v181_v39 = vpop.f32.mrb[1].mxu0 }
 0x138   :  { %v182_v40 = vadd.f32 %v181_v39, %v118_v36  ;;  %v183_v41 = vpop.f32.mrb[2].mxu0 }
 0x139   :  { %v184_v42 = vadd.f32 %v183_v41, %v114_v35  ;;  %v185_v43 = vpop.f32.mrb[3].mxu0  ;;  %v188_v45 = vmax.f32 %v180_v38, 0.0 }
 0x13a   :  { %v186_v44 = vadd.f32 %v185_v43, %v118_v36  ;;  %v189_v47 = vmax.f32 %v182_v40, 0.0 }
 0x13b   :  { %v190_v46 = vmax.f32 %v184_v42, 0.0 }
 0x13c   :  { %v191_v48 = vmax.f32 %v186_v44, 0.0 }
 0x13d   :  { %v192_v49 = vpack.c.bf16 %v190_v46, %v188_v45 }
 0x13e   :  { %v193_v50 = vpack.c.bf16 %v191_v48, %v189_v47 }
 0x140   :  { %361 = vmatprep.mubr.bf16.mxu1 %v193_v50 }
 0x141   :  { %362 = vmatmul.mubr.bf16.vlgmr.msra.gmra.mrb[0].mxu1 %v192_v49 }
 0x142   :  { %737 = vmatprep.mubr.msk.bf16.mxu1 %vm943_vm1, %v942_v25  ;;  %722 = vmatpush3.bf16.msra.mxu1 %v784_v54 }
 0x143   :  { %723 = vmatprep.subr.bf16.mxu1 %v942_v25 }
 0x146   :  { %724 = vmatpush3.bf16.msra.mxu1 %v785_v55 }
 0x147   :  { %725 = vmatprep.subr.bf16.mxu1 %v942_v25 }
 0x14a   :  { %726 = vmatpush3.bf16.msra.mxu1 %v786_v56 }
 0x14b   :  { %727 = vmatprep.subr.bf16.mxu1 %v942_v25 }
 0x14e   :  { %728 = vmatpush3.bf16.msra.mxu1 %v787_v57 }
 0x14f   :  { %729 = vmatprep.subr.bf16.mxu1 %v942_v25 }
 0x152   :  { %730 = vmatpush3.bf16.msra.mxu1 %v788_v58 }
 0x153   :  { %731 = vmatprep.subr.bf16.mxu1 %v942_v25 }
 0x156   :  { %732 = vmatpush3.bf16.msra.mxu1 %v789_v59 }
 0x157   :  { %733 = vmatprep.subr.bf16.mxu1 %v942_v25 }
 0x15a   :  { %734 = vmatpush3.bf16.msra.mxu1 %v790_v8 }
 0x15b   :  { %735 = vmatprep.subr.bf16.mxu1 %v942_v25 }
 0x15e   :  { %736 = vmatpush3.bf16.msra.mxu1 %v791_v9 }
 0x214   :  { %v677_v60 = vpop.f32.mrb[0].mxu1 }
 0x215   :  { %v678_v62 = vpop.f32.mrb[1].mxu1 }
 0x216   :  { %v679_v63 = vadd.f32 %v678_v62, %v677_v60  ;;  %v680_v0 = vpop.f32.mrb[2].mxu1 }
 0x217   :  { %v681_v1 = vpop.f32.mrb[3].mxu1 }
 0x218   :  { %v364_v2 = vadd.f32 %v679_v63, %v626_v61  ;;  %v682_v3 = vadd.f32 %v681_v1, %v680_v0 }
 0x21a   :  { %v367_v4 = vadd.f32 %v682_v3, %v626_v61  ;;  %v370_v5 = vmax.f32 %v364_v2, 0.0 }
 0x21c   :  { %v371_v6 = vmax.f32 %v367_v4, 0.0 }
 0x21e   :  { %v372_v7 = vpack.c.bf16 %v371_v6, %v370_v5 }
 0x220   :  { %718 = vmatmul.mubr.bf16.vlgmr.msra.gmra.mrb[4].mxu0 %v372_v7 }
 0x2f3   :  { %v478_v11 = vpop.f32.mrb[4].mxu0 }
 0x2f4   :  { %v479_v12 = vadd.f32 %v643_v10, %v478_v11  ;;  %v719_v13 = vpop.f32.mrb[5].mxu0 }
 0x2f5   :  { %v481_v14 = vpop.f32.mrb[6].mxu0 }
 0x2f6   :  { %v482_v15 = vadd.f32 %v643_v10, %v481_v14  ;;  %v720_v16 = vpop.f32.mrb[7].mxu0  ;;  %v485_v17 = vmax.f32 %v479_v12, 0.0 }
 0x2f8   :  { %v486_v18 = vmax.f32 %v482_v15, 0.0 }
 0x2fa   :  { %v487_v19 = vpack.c.bf16 %v486_v18, %v485_v17 }
 0x2fc   :  { %738 = vmatmul.mubr.bf16.vlgmr.msra.gmra.mrb[4].mxu1 %v487_v19 }
 0x3cf   :  { %v593_v21 = vpop.f32.mrb[4].mxu1 }
 0x3d0   :  { %v594_v22 = vadd.f32 %v652_v20, %v593_v21  ;;  %v739_v23 = vpop.f32.mrb[5].mxu1 }
 0x3d1   :  { %v596_v24 = vpop.f32.mrb[6].mxu1 }
 0x3d2   :  { %600 = vst [vmem:[#allocation11] sm:$0xff] %v594_v22  ;;  %v597_v25 = vadd.f32 %v652_v20, %v596_v24  ;;  %v740_v26 = vpop.f32.mrb[7].mxu1 }
 0x3d4   :  { %601 = vst [vmem:[#allocation11 + $0x8] sm:$0xff] %v597_v25 }
 0x3d5   :  { %913 = shalt.err (!%p910_p2)
}
 0x3d6   :  { %s914_s18 = scalar_lea.hbm %s1124_s9, 256 }
 0x3d7   :  { %p915_p3 = scmp.ne.s32.totalorder %s1124_s9, %s914_s18  ;;  %p918_p4 = scmp.lt.u32.totalorder %s914_s18, %s1124_s9 }
 0x3d9   :  { %p920_p5 = pnand %p918_p4, %p915_p3 }
 0x3db   :  { %923 = shalt.err (!%p920_p5)
}
 0x3dc   :  { %613 = dma.vmem_to_hbm [thread:$0]  %s608_s16, 256, %s1124_s9, [#allocation4], %s933_s19, %s933_s19, %s934_s20  }
 0x3dd   :  { %930 = dma.done.wait [#allocation4], 256  }
 0x3de   :  { %931 = vsyncadd [#allocation4], 4294967040 }
 0x3df   :  { %617 = vsyncpa [#allocation3], 1 }
 0x3e0   :  { %618 = vsyncpa [#allocation6], 1 }
 0x3e1   :  { %619 = vsyncpa [#allocation9], 1 }
 0x3e2   :  { %620 = vsyncpa [#allocation4], 1 }

// kernel: tpu_custom_call.1
= control target key start
LH: loop header
LB: loop body
LE: loop exit
PB: predicated region body
PF: predicated region fallthrough
CT: control target
= control target key end

     0   :  { %14 = vsyncpa [#allocation3], 0  ;;  %s1115_s0 = inlined_call_operand.hbm [shape: f32[16,32], index: 0, kind: input, shape index: {}]   ;;  %s1116_s1 = inlined_call_operand.hbm [shape: bf16[32,256], index: 1, kind: input, shape index: {}]   ;;  %s1117_s2 = inlined_call_operand.vmem [shape: f32[1,256], index: 2, kind: input, shape index: {}]   ;;  %s1118_s3 = inlined_call_operand.hbm [shape: bf16[256,128], index: 3, kind: input, shape index: {}]   ;;  %s1119_s4 = inlined_call_operand.vmem [shape: f32[1,128], index: 4, kind: input, shape index: {}]   ;;  %s1120_s5 = inlined_call_operand.hbm [shape: bf16[128,128], index: 5, kind: input, shape index: {}]   ;;  %s1121_s6 = inlined_call_operand.vmem [shape: f32[1,128], index: 6, kind: input, shape index: {}]   ;;  %s1122_s7 = inlined_call_operand.hbm [shape: bf16[128,128], index: 7, kind: input, shape index: {}]   ;;  %s1123_s8 = inlined_call_operand.vmem [shape: f32[1,128], index: 8, kind: input, shape index: {}]   ;;  %s1124_s9 = inlined_call_operand.hbm [shape: f32[16,128], index: 9, kind: output, shape index: {}]  }
   0x1   :  { %15 = vsyncpa [#allocation6], 0 }
   0x2   :  { %16 = vsyncpa [#allocation9], 0 }
   0x3   :  { %17 = vsyncpa [#allocation4], 0  ;;  %s932_s30 = smov [#allocation5]   ;;  %s792_s13 = scalar_lea.hbm %s1116_s1, 512 }
   0x4   :  { %s35_s10 = sshll.u32 %s932_s30, 4  ;;  %p793_p0 = scmp.ne.s32.totalorder %s1116_s1, %s792_s13  ;;  %s36_s10 = int_to_ptr.vmem [resolvable:$true] %s35_s10 }
   0x5   :  { %p796_p1 = scmp.lt.u32.totalorder %s792_s13, %s1116_s1 }
   0x7   :  { %p798_p2 = pnand %p796_p1, %p793_p0 }
   0x9   :  { %801 = shalt.err (!%p798_p2)
}
   0xa   :  { %s802_s18 = scalar_lea.vmem %s36_s10, 512  ;;  %p807_p4 = scmp.lt.s32.totalorder %s36_s10, %s36_s10 }
   0xb   :  { %p803_p3 = scmp.ne.s32.totalorder %s36_s10, %s802_s18  ;;  %p808_p5 = scmp.lt.s32.totalorder %s802_s18, %s802_s18 }
   0xd   :  { %p809_p6 = por %p808_p5, %p807_p4 }
   0xf   :  { %p810_p7 = pnand %p809_p6, %p803_p3 }
  0x11   :  { %813 = shalt.err (!%p810_p7)
}
  0x12   :  { %s933_s19 = smov 128   ;;  %s934_s20 = smov 8  }
  0x13   :  { %41 = dma.hbm_to_vmem [thread:$0]  %s1116_s1, 512, %s36_s10, [#allocation6], %s933_s19, %s933_s19, %s934_s20  }
  0x14   :  { %s935_s23 = smov [#allocation8]   ;;  %s936_s25 = smov [#allocation2]  }
  0x15   :  { %s63_s24 = sshll.u32 %s935_s23, 4  ;;  %s23_s26 = sshll.u32 %s936_s25, 4  ;;  %s64_s24 = int_to_ptr.vmem [resolvable:$true] %s63_s24  ;;  %s24_s26 = int_to_ptr.vmem [resolvable:$true] %s23_s26 }
  0x16   :  { %s814_s29 = scalar_lea.hbm %s1120_s5, 1024 }
  0x17   :  { %p815_p8 = scmp.ne.s32.totalorder %s1120_s5, %s814_s29  ;;  %p818_p9 = scmp.lt.u32.totalorder %s814_s29, %s1120_s5 }
  0x19   :  { %p820_p10 = pnand %p818_p9, %p815_p8 }
  0x1b   :  { %823 = shalt.err (!%p820_p10)
}
  0x1c   :  { %s824_s1 = scalar_lea.vmem %s64_s24, 1024  ;;  %p829_p12 = scmp.lt.s32.totalorder %s64_s24, %s64_s24 }
  0x1d   :  { %p825_p11 = scmp.ne.s32.totalorder %s64_s24, %s824_s1  ;;  %p830_p13 = scmp.lt.s32.totalorder %s824_s1, %s824_s1 }
  0x1f   :  { %p831_p0 = por %p830_p13, %p829_p12 }
  0x21   :  { %p832_p1 = pnand %p831_p0, %p825_p11 }
  0x23   :  { %835 = shalt.err (!%p832_p1)
}
  0x24   :  { %s937_s10 = smov 64   ;;  %s938_s14 = smov 4  }
  0x25   :  { %69 = dma.hbm_to_vmem [thread:$0]  %s1120_s5, 1024, %s64_s24, [#allocation9], %s937_s10, %s937_s10, %s938_s14  }
  0x26   :  { %s836_s21 = scalar_lea.hbm %s1115_s0, 256 }
  0x27   :  { %p837_p2 = scmp.ne.s32.totalorder %s1115_s0, %s836_s21  ;;  %p840_p3 = scmp.lt.u32.totalorder %s836_s21, %s1115_s0 }
  0x29   :  { %p842_p4 = pnand %p840_p3, %p837_p2 }
  0x2b   :  { %845 = shalt.err (!%p842_p4)
}
  0x2c   :  { %s846_s28 = scalar_lea.vmem %s24_s26, 256  ;;  %p851_p6 = scmp.lt.s32.totalorder %s24_s26, %s24_s26 }
  0x2d   :  { %p847_p5 = scmp.ne.s32.totalorder %s24_s26, %s846_s28  ;;  %p852_p7 = scmp.lt.s32.totalorder %s846_s28, %s846_s28 }
  0x2f   :  { %p853_p8 = por %p852_p7, %p851_p6 }
  0x31   :  { %p854_p9 = pnand %p853_p8, %p847_p5 }
  0x33   :  { %857 = shalt.err (!%p854_p9)
}
  0x34   :  { %29 = dma.hbm_to_vmem [thread:$0]  %s1115_s0, 256, %s24_s26, [#allocation3], %s933_s19, %s933_s19, %s934_s20  }
  0x35   :  { %s939_s29 = smov [#allocation7]   ;;  %s940_s11 = smov [#allocation10]  }
  0x36   :  { %s49_s30 = sshll.u32 %s939_s29, 4  ;;  %s77_s12 = sshll.u32 %s940_s11, 4  ;;  %s50_s30 = int_to_ptr.vmem [resolvable:$true] %s49_s30  ;;  %s78_s12 = int_to_ptr.vmem [resolvable:$true] %s77_s12 }
  0x37   :  { %s858_s15 = scalar_lea.hbm %s1118_s3, 2048 }
  0x38   :  { %p859_p10 = scmp.ne.s32.totalorder %s1118_s3, %s858_s15  ;;  %p862_p11 = scmp.lt.u32.totalorder %s858_s15, %s1118_s3 }
  0x3a   :  { %p864_p12 = pnand %p862_p11, %p859_p10 }
  0x3c   :  { %867 = shalt.err (!%p864_p12)
}
  0x3d   :  { %s868_s0 = scalar_lea.vmem %s50_s30, 2048  ;;  %p873_p0 = scmp.lt.s32.totalorder %s50_s30, %s50_s30 }
  0x3e   :  { %p869_p13 = scmp.ne.s32.totalorder %s50_s30, %s868_s0  ;;  %p874_p1 = scmp.lt.s32.totalorder %s868_s0, %s868_s0 }
  0x40   :  { %p875_p2 = por %p874_p1, %p873_p0 }
  0x42   :  { %p876_p3 = pnand %p875_p2, %p869_p13 }
  0x44   :  { %879 = shalt.err (!%p876_p3)
}
  0x45   :  { %55 = dma.hbm_to_vmem [thread:$0]  %s1118_s3, 2048, %s50_s30, [#allocation6], %s937_s10, %s937_s10, %s938_s14  }
  0x46   :  { %s880_s27 = scalar_lea.hbm %s1122_s7, 1024 }
  0x47   :  { %p881_p4 = scmp.ne.s32.totalorder %s1122_s7, %s880_s27  ;;  %p884_p5 = scmp.lt.u32.totalorder %s880_s27, %s1122_s7 }
  0x49   :  { %p886_p6 = pnand %p884_p5, %p881_p4 }
  0x4b   :  { %889 = shalt.err (!%p886_p6)
}
  0x4c   :  { %s890_s11 = scalar_lea.vmem %s78_s12, 1024  ;;  %p895_p8 = scmp.lt.s32.totalorder %s78_s12, %s78_s12 }
  0x4d   :  { %p891_p7 = scmp.ne.s32.totalorder %s78_s12, %s890_s11  ;;  %p896_p9 = scmp.lt.s32.totalorder %s890_s11, %s890_s11 }
  0x4f   :  { %p897_p10 = por %p896_p9, %p895_p8 }
  0x51   :  { %p898_p11 = pnand %p897_p10, %p891_p7 }
  0x53   :  { %901 = shalt.err (!%p898_p11)
}
  0x54   :  { %83 = dma.hbm_to_vmem [thread:$0]  %s1122_s7, 1024, %s78_s12, [#allocation9], %s937_s10, %s937_s10, %s938_s14  }
  0x55   :  { %924 = dma.done.wait [#allocation3], 256  }
  0x56   :  { %925 = vsyncadd [#allocation3], 4294967040 }
  0x57   :  { %926 = dma.done.wait [#allocation6], 2560  }
  0x58   :  { %927 = vsyncadd [#allocation6], 4294964736 }
  0x59   :  { %928 = dma.done.wait [#allocation9], 2048  }
  0x5a   :  { %929 = vsyncadd [#allocation9], 4294965248  ;;  %v941_v0 = vmov 0   ;;  %v754_v1 = vld [vmem:[#allocation5 + $0x4] ss:$8 sps:$4 sm:$0xff]   ;;  %v102_v5 = vld [vmem:[#allocation2] sm:$0xff]  ;;  %v111_v30 = vlaneseq }
  0x5b   :  { %177 = vmatprep.mubr.bf16.mxu0 %v941_v0  ;;  %v756_v2 = vld [vmem:[#allocation5] ss:$8 sps:$4 sm:$0xff]   ;;  %145 = vmatprep.subr.bf16.mxu0 %v754_v1  ;;  %v757_v3 = vld [vmem:[#allocation5 + $0x14] ss:$8 sps:$4 sm:$0xff]   ;;  %v759_v4 = vld [vmem:[#allocation5 + $0x10] ss:$8 sps:$4 sm:$0xff]  }
  0x5c   :  { %146 = vmatpush1.bf16.msra.mxu0 %v756_v2  ;;  %v103_v6 = vld [vmem:[#allocation2 + $0x8] sm:$0xff]  ;;  %v760_v7 = vld [vmem:[#allocation7 + $0x40] sm:$0xff]   ;;  %v762_v10 = vld [vmem:[#allocation7 + $0x48] sm:$0xff]   ;;  %vm141_vm0 = vcmask 261120   ;;  %v942_v25 = vmov 0.0   ;;  %v112_v31 = vshrl.u32 %v111_v30, 7 }
  0x5d   :  { %147 = vmatprep.subr.bf16.mxu0 %v757_v3  ;;  %v761_v8 = vld [vmem:[#allocation7] sm:$0xff]   ;;  %v104_v9 = vpack.c.bf16 %v103_v6, %v102_v5  ;;  %661 = vmatprep.subr.bf16.mxu1 %v760_v7  ;;  %v763_v11 = vld [vmem:[#allocation7 + $0x8] sm:$0xff]   ;;  %v764_v12 = vld [vmem:[#allocation7 + $0x50] sm:$0xff]   ;;  %vm943_vm1 = vmmov 0   ;;  %s944_s15 = smov [#allocation11]  }
  0x5e   :  { %662 = vmatpush3.bf16.msra.mxu1 %v761_v8  ;;  %v765_v13 = vld [vmem:[#allocation7 + $0x10] sm:$0xff]   ;;  %v766_v14 = vld [vmem:[#allocation7 + $0x58] sm:$0xff]   ;;  %v768_v16 = vld [vmem:[#allocation7 + $0x60] sm:$0xff]   ;;  %v113_v32 = vsub.s32 0, %v112_v31  ;;  %v117_v34 = vsub.s32 1, %v112_v31  ;;  %s607_s16 = sshll.u32 %s944_s15, 4  ;;  %s608_s16 = int_to_ptr.vmem [resolvable:$true] %s607_s16 }
  0x5f   :  { %663 = vmatprep.subr.bf16.mxu1 %v762_v10  ;;  %v767_v15 = vld [vmem:[#allocation7 + $0x18] sm:$0xff]   ;;  %v769_v17 = vld [vmem:[#allocation7 + $0x20] sm:$0xff]   ;;  %v770_v18 = vld [vmem:[#allocation7 + $0x68] sm:$0xff]   ;;  %p907_p13 = scmp.lt.s32.totalorder %s608_s16, %s608_s16 }
  0x60   :  { %148 = vmatpush1.bf16.msra.mxu0 %v759_v4  ;;  %v771_v19 = vld [vmem:[#allocation7 + $0x28] sm:$0xff]   ;;  %v772_v20 = vld [vmem:[#allocation7 + $0x70] sm:$0xff]   ;;  %v774_v22 = vld [vmem:[#allocation7 + $0x78] sm:$0xff]  }
  0x61   :  { %v773_v21 = vld [vmem:[#allocation7 + $0x30] sm:$0xff]   ;;  %v775_v23 = vld [vmem:[#allocation7 + $0x38] sm:$0xff]   ;;  %v776_v24 = vld [vmem:[#allocation8] sm:$0xff]   ;;  %701 = vmatprep.subr.bf16.mxu0 %v942_v25 }
  0x62   :  { %664 = vmatpush3.bf16.msra.mxu1 %v763_v11  ;;  %v777_v26 = vld [vmem:[#allocation8 + $0x8] sm:$0xff]   ;;  %v778_v27 = vld [vmem:[#allocation8 + $0x10] sm:$0xff]   ;;  %v779_v28 = vld [vmem:[#allocation8 + $0x18] sm:$0xff]  }
  0x63   :  { %625 = vmatmul.mubr.msk.bf16.vlgmr.msra.gmra.mrb[0].mxu0 %vm141_vm0, %v104_v9  ;;  %665 = vmatprep.subr.bf16.mxu1 %v764_v12  ;;  %v780_v29 = vld [vmem:[#allocation8 + $0x20] sm:$0xff]   ;;  %v109_v33 = vld [vmem:[%s1117_s2] sm:$0x3]  ;;  %v781_v51 = vld [vmem:[#allocation8 + $0x28] sm:$0xff]  }
  0x64   :  { %702 = vmatpush3.bf16.msra.mxu0 %v776_v24  ;;  %v114_v35 = vrot.slane %v109_v33, %v113_v32  ;;  %v118_v36 = vrot.slane %v109_v33, %v117_v34  ;;  %v782_v52 = vld [vmem:[#allocation8 + $0x30] sm:$0xff]   ;;  %v783_v53 = vld [vmem:[#allocation8 + $0x38] sm:$0xff]   ;;  %717 = vmatprep.mubr.msk.bf16.mxu0 %vm943_vm1, %v942_v25  ;;  %v784_v54 = vld [vmem:[#allocation10] sm:$0xff]  }
  0x65   :  { %703 = vmatprep.subr.bf16.mxu0 %v942_v25  ;;  %v785_v55 = vld [vmem:[#allocation10 + $0x8] sm:$0xff]   ;;  %v786_v56 = vld [vmem:[#allocation10 + $0x10] sm:$0xff]   ;;  %v787_v57 = vld [vmem:[#allocation10 + $0x18] sm:$0xff]  }
  0x66   :  { %666 = vmatpush3.bf16.msra.mxu1 %v765_v13  ;;  %v788_v58 = vld [vmem:[#allocation10 + $0x20] sm:$0xff]   ;;  %v789_v59 = vld [vmem:[#allocation10 + $0x28] sm:$0xff]   ;;  %v626_v61 = vld [vmem:[%s1119_s4] ss:$0 sm:$0xff] }
  0x67   :  { %667 = vmatprep.subr.bf16.mxu1 %v766_v14  ;;  %v790_v8 = vld [vmem:[#allocation10 + $0x30] sm:$0xff]   ;;  %v791_v9 = vld [vmem:[#allocation10 + $0x38] sm:$0xff]  }
  0x68   :  { %704 = vmatpush3.bf16.msra.mxu0 %v777_v26  ;;  %v643_v10 = vld [vmem:[%s1121_s6] ss:$0 sm:$0xff]  ;;  %s902_s6 = scalar_lea.vmem %s608_s16, 256 }
  0x69   :  { %705 = vmatprep.subr.bf16.mxu0 %v942_v25  ;;  %p903_p12 = scmp.ne.s32.totalorder %s608_s16, %s902_s6  ;;  %p908_p0 = scmp.lt.s32.totalorder %s902_s6, %s902_s6 }
  0x6a   :  { %668 = vmatpush3.bf16.msra.mxu1 %v767_v15 }
  0x6b   :  { %669 = vmatprep.subr.bf16.mxu1 %v768_v16  ;;  %p909_p1 = por %p908_p0, %p907_p13 }
  0x6c   :  { %706 = vmatpush3.bf16.msra.mxu0 %v778_v27 }
  0x6d   :  { %707 = vmatprep.subr.bf16.mxu0 %v942_v25  ;;  %p910_p2 = pnand %p909_p1, %p903_p12 }
  0x6e   :  { %670 = vmatpush3.bf16.msra.mxu1 %v769_v17 }
  0x6f   :  { %671 = vmatprep.subr.bf16.mxu1 %v770_v18 }
  0x70   :  { %708 = vmatpush3.bf16.msra.mxu0 %v779_v28 }
  0x71   :  { %709 = vmatprep.subr.bf16.mxu0 %v942_v25 }
  0x72   :  { %672 = vmatpush3.bf16.msra.mxu1 %v771_v19 }
  0x73   :  { %673 = vmatprep.subr.bf16.mxu1 %v772_v20  ;;  %v652_v20 = vld [vmem:[%s1123_s8] ss:$0 sm:$0xff] }
  0x74   :  { %710 = vmatpush3.bf16.msra.mxu0 %v780_v29 }
  0x75   :  { %711 = vmatprep.subr.bf16.mxu0 %v942_v25 }
  0x76   :  { %674 = vmatpush3.bf16.msra.mxu1 %v773_v21 }
  0x77   :  { %675 = vmatprep.subr.bf16.mxu1 %v774_v22 }
  0x78   :  { %712 = vmatpush3.bf16.msra.mxu0 %v781_v51 }
  0x79   :  { %713 = vmatprep.subr.bf16.mxu0 %v942_v25 }
  0x7a   :  { %676 = vmatpush3.bf16.msra.mxu1 %v775_v23 }
  0x7b   :  { %721 = vmatprep.subr.bf16.mxu1 %v942_v25 }
  0x7c   :  { %714 = vmatpush3.bf16.msra.mxu0 %v782_v52 }
  0x7d   :  { %715 = vmatprep.subr.bf16.mxu0 %v942_v25 }
  0x80   :  { %716 = vmatpush3.bf16.msra.mxu0 %v783_v53 }
 0x136   :  { %v179_v37 = vpop.f32.mrb[0].mxu0 }
 0x137   :  { %v180_v38 = vadd.f32 %v179_v37, %v114_v35  ;;  %v181_v39 = vpop.f32.mrb[1].mxu0 }
 0x138   :  { %v182_v40 = vadd.f32 %v181_v39, %v118_v36  ;;  %v183_v41 = vpop.f32.mrb[2].mxu0 }
 0x139   :  { %v184_v42 = vadd.f32 %v183_v41, %v114_v35  ;;  %v185_v43 = vpop.f32.mrb[3].mxu0  ;;  %v188_v45 = vmax.f32 %v180_v38, 0.0 }
 0x13a   :  { %v186_v44 = vadd.f32 %v185_v43, %v118_v36  ;;  %v189_v47 = vmax.f32 %v182_v40, 0.0 }
 0x13b   :  { %v190_v46 = vmax.f32 %v184_v42, 0.0 }
 0x13c   :  { %v191_v48 = vmax.f32 %v186_v44, 0.0 }
 0x13d   :  { %v192_v49 = vpack.c.bf16 %v190_v46, %v188_v45 }
 0x13e   :  { %v193_v50 = vpack.c.bf16 %v191_v48, %v189_v47 }
 0x140   :  { %361 = vmatprep.mubr.bf16.mxu1 %v193_v50 }
 0x141   :  { %362 = vmatmul.mubr.bf16.vlgmr.msra.gmra.mrb[0].mxu1 %v192_v49 }
 0x142   :  { %737 = vmatprep.mubr.msk.bf16.mxu1 %vm943_vm1, %v942_v25  ;;  %722 = vmatpush3.bf16.msra.mxu1 %v784_v54 }
 0x143   :  { %723 = vmatprep.subr.bf16.mxu1 %v942_v25 }
 0x146   :  { %724 = vmatpush3.bf16.msra.mxu1 %v785_v55 }
 0x147   :  { %725 = vmatprep.subr.bf16.mxu1 %v942_v25 }
 0x14a   :  { %726 = vmatpush3.bf16.msra.mxu1 %v786_v56 }
 0x14b   :  { %727 = vmatprep.subr.bf16.mxu1 %v942_v25 }
 0x14e   :  { %728 = vmatpush3.bf16.msra.mxu1 %v787_v57 }
 0x14f   :  { %729 = vmatprep.subr.bf16.mxu1 %v942_v25 }
 0x152   :  { %730 = vmatpush3.bf16.msra.mxu1 %v788_v58 }
 0x153   :  { %731 = vmatprep.subr.bf16.mxu1 %v942_v25 }
 0x156   :  { %732 = vmatpush3.bf16.msra.mxu1 %v789_v59 }
 0x157   :  { %733 = vmatprep.subr.bf16.mxu1 %v942_v25 }
 0x15a   :  { %734 = vmatpush3.bf16.msra.mxu1 %v790_v8 }
 0x15b   :  { %735 = vmatprep.subr.bf16.mxu1 %v942_v25 }
 0x15e   :  { %736 = vmatpush3.bf16.msra.mxu1 %v791_v9 }
 0x214   :  { %v677_v60 = vpop.f32.mrb[0].mxu1 }
 0x215   :  { %v678_v62 = vpop.f32.mrb[1].mxu1 }
 0x216   :  { %v679_v63 = vadd.f32 %v678_v62, %v677_v60  ;;  %v680_v0 = vpop.f32.mrb[2].mxu1 }
 0x217   :  { %v681_v1 = vpop.f32.mrb[3].mxu1 }
 0x218   :  { %v364_v2 = vadd.f32 %v679_v63, %v626_v61  ;;  %v682_v3 = vadd.f32 %v681_v1, %v680_v0 }
 0x21a   :  { %v367_v4 = vadd.f32 %v682_v3, %v626_v61  ;;  %v370_v5 = vmax.f32 %v364_v2, 0.0 }
 0x21c   :  { %v371_v6 = vmax.f32 %v367_v4, 0.0 }
 0x21e   :  { %v372_v7 = vpack.c.bf16 %v371_v6, %v370_v5 }
 0x220   :  { %718 = vmatmul.mubr.bf16.vlgmr.msra.gmra.mrb[4].mxu0 %v372_v7 }
 0x2f3   :  { %v478_v11 = vpop.f32.mrb[4].mxu0 }
 0x2f4   :  { %v479_v12 = vadd.f32 %v643_v10, %v478_v11  ;;  %v719_v13 = vpop.f32.mrb[5].mxu0 }
 0x2f5   :  { %v481_v14 = vpop.f32.mrb[6].mxu0 }
 0x2f6   :  { %v482_v15 = vadd.f32 %v643_v10, %v481_v14  ;;  %v720_v16 = vpop.f32.mrb[7].mxu0  ;;  %v485_v17 = vmax.f32 %v479_v12, 0.0 }
 0x2f8   :  { %v486_v18 = vmax.f32 %v482_v15, 0.0 }
 0x2fa   :  { %v487_v19 = vpack.c.bf16 %v486_v18, %v485_v17 }
 0x2fc   :  { %738 = vmatmul.mubr.bf16.vlgmr.msra.gmra.mrb[4].mxu1 %v487_v19 }
 0x3cf   :  { %v593_v21 = vpop.f32.mrb[4].mxu1 }
 0x3d0   :  { %v594_v22 = vadd.f32 %v652_v20, %v593_v21  ;;  %v739_v23 = vpop.f32.mrb[5].mxu1 }
 0x3d1   :  { %v596_v24 = vpop.f32.mrb[6].mxu1 }
 0x3d2   :  { %600 = vst [vmem:[#allocation11] sm:$0xff] %v594_v22  ;;  %v597_v25 = vadd.f32 %v652_v20, %v596_v24  ;;  %v740_v26 = vpop.f32.mrb[7].mxu1 }
 0x3d4   :  { %601 = vst [vmem:[#allocation11 + $0x8] sm:$0xff] %v597_v25 }
 0x3d5   :  { %913 = shalt.err (!%p910_p2)
}
 0x3d6   :  { %s914_s18 = scalar_lea.hbm %s1124_s9, 256 }
 0x3d7   :  { %p915_p3 = scmp.ne.s32.totalorder %s1124_s9, %s914_s18  ;;  %p918_p4 = scmp.lt.u32.totalorder %s914_s18, %s1124_s9 }
 0x3d9   :  { %p920_p5 = pnand %p918_p4, %p915_p3 }
 0x3db   :  { %923 = shalt.err (!%p920_p5)
}
 0x3dc   :  { %613 = dma.vmem_to_hbm [thread:$0]  %s608_s16, 256, %s1124_s9, [#allocation4], %s933_s19, %s933_s19, %s934_s20  }
 0x3dd   :  { %930 = dma.done.wait [#allocation4], 256  }
 0x3de   :  { %931 = vsyncadd [#allocation4], 4294967040 }
 0x3df   :  { %617 = vsyncpa [#allocation3], 1 }
 0x3e0   :  { %618 = vsyncpa [#allocation6], 1 }
 0x3e1   :  { %619 = vsyncpa [#allocation9], 1 }
 0x3e2   :  { %620 = vsyncpa [#allocation4], 1 }

</bundles_post_ra>
